<compile_context>
chip_gen: v5e
topology: v5e:2x2
jax: 0.10.0
libtpu: 0.0.40
codegen_flags: <defaults>
</compile_context>

<pallas_src>
import numpy as np
import jax
import jax.numpy as jnp
from jax.experimental import pallas as pl
from jax.experimental.pallas import tpu as pltpu

KSIZE = 5
PAD = 2
FILTERS = [32, 16, 4]
WINDOWS = [2, 2, 4]


# ----------------------------- Pallas kernel --------------------------------

def conv_block_kernel(x_ref, a1_ref, b1_ref, a2_ref, b2_ref, a3_ref, b3_ref,
                      aout_ref, out_ref):
    # x_ref: (NB, C_in*L)  -- batch on sublanes, channel*length on lanes.
    h = x_ref[...]
    h = jnp.maximum(
        jnp.dot(h, a1_ref[...], preferred_element_type=jnp.float32) + b1_ref[...], 0.0)
    h = jnp.maximum(
        jnp.dot(h, a2_ref[...], preferred_element_type=jnp.float32) + b2_ref[...], 0.0)
    h = jnp.maximum(
        jnp.dot(h, a3_ref[...], preferred_element_type=jnp.float32) + b3_ref[...], 0.0)
    out_ref[...] = jnp.dot(h, aout_ref[...], preferred_element_type=jnp.float32)


# ------------------------- constant-matrix folding ---------------------------

def _shift_mats(L):
    """S[k, j, j'] = 1 iff tap k at output position j' reads x[:, j] under
    replicate (edge) padding of 2."""
    S = np.zeros((KSIZE, L, L), np.float32)
    for k in range(KSIZE):
        for jp in range(L):
            src = min(max(jp + k - PAD, 0), L - 1)
            S[k, src, jp] = 1.0
    return S


def _pool_matrix(L, w, ceil_mode=False):
    Lout = -(-L // w) if ceil_mode else L // w
    P = np.zeros((L, Lout), np.float32)
    for j in range(Lout):
        s, e = j * w, min(j * w + w, L)
        P[s:e, j] = 1.0 / (e - s)  # partial last window divides by valid count
    return P, Lout


def _pool_big(Co, L, w, ceil_mode=False):
    """Block-diagonal (Co*L, Co*Lout) pooling matrix acting on flattened acts."""
    P, Lout = _pool_matrix(L, w, ceil_mode)
    return jnp.asarray(np.kron(np.eye(Co, dtype=np.float32), P)), Lout


def _fold_layer(layer, L, eps):
    """Fold conv(k=5, replicate pad) + conv bias + BatchNorm(eval) into a dense
    (Ci*L, Co*L) matrix and a (Co*L,) bias on channel-major flattened acts."""
    W = layer["w"]                                            # (Co, Ci, 5)
    Co, Ci, _ = W.shape
    scale = layer["gamma"] / jnp.sqrt(layer["var"] + eps)     # (Co,)
    shift = layer["beta"] + scale * (layer["b"] - layer["mean"])
    S = jnp.asarray(_shift_mats(L))                           # (5, L, L)
    Ws = W * scale[:, None, None]
    M = jnp.einsum("ock,kjm->cjom", Ws, S).reshape(Ci * L, Co * L)
    bias = jnp.repeat(shift, L)                               # (Co*L,)
    return M, bias


# ------------------------------ wrapper --------------------------------------

def conv_block_forward(x, params, eps=1e-5, batch_block=512):
    N, C_in, L0 = x.shape
    L1 = L0 // WINDOWS[0]
    L2 = L1 // WINDOWS[1]

    M1, b1 = _fold_layer(params["layer1"], L0, eps)           # (C_in*L0, 32*L0)
    M2, b2 = _fold_layer(params["layer2"], L1, eps)           # (32*L1, 16*L1)
    M3, b3 = _fold_layer(params["layer3"], L2, eps)           # (16*L2, 4*L2)
    P1, _ = _pool_big(FILTERS[0], L0, WINDOWS[0])             # (32*L0, 32*L1)
    P2, _ = _pool_big(FILTERS[1], L1, WINDOWS[1])             # (16*L1, 16*L2)
    P3, L3 = _pool_big(FILTERS[2], L2, WINDOWS[2], True)      # (4*L2, 4*L3)

    # Dropout between pool_l and conv_{l+1} is identity in eval mode, so each
    # pooling matrix folds straight into the next layer's matrix.
    A1, A2, A3, Aout = M1, P1 @ M2, P2 @ M3, P3
    b1r, b2r, b3r = b1[None, :], b2[None, :], b3[None, :]

    D_in = C_in * L0
    D_out = FILTERS[2] * L3

    # Batch on sublanes, channel*length on lanes (natural layout of (N, C, L)).
    x2 = x.reshape(N, D_in)
    if N > batch_block:
        NB = batch_block
        Np = pl.cdiv(N, NB) * NB
        if Np != N:
            x2 = jnp.pad(x2, ((0, Np - N), (0, 0)))
    else:
        NB, Np = N, N

    def whole(a):
        nd = a.ndim
        return pl.BlockSpec(a.shape, lambda n, nd=nd: (0,) * nd)

    out = pl.pallas_call(
        conv_block_kernel,
        out_shape=jax.ShapeDtypeStruct((Np, D_out), jnp.float32),
        grid=(Np // NB,),
        in_specs=[
            pl.BlockSpec((NB, D_in), lambda n: (n, 0)),
            whole(A1), whole(b1r), whole(A2), whole(b2r),
            whole(A3), whole(b3r), whole(Aout),
        ],
        out_specs=pl.BlockSpec((NB, D_out), lambda n: (n, 0)),
        compiler_params=pltpu.CompilerParams(
            dimension_semantics=("parallel",)),
    )(x2, A1, b1r, A2, b2r, A3, b3r, Aout)

    # Already (N, 4*L3), matching torch out.view(out.size(0), -1).
    return out[:N]


# --------------------------- params & reference ------------------------------

def make_params(key, in_channels):
    keys = jax.random.split(key, 4 * len(FILTERS))
    params = {}
    cin = in_channels
    for i, cout in enumerate(FILTERS):
        kw, kb, kg, kbe = keys[4 * i:4 * i + 4]
        params[f"layer{i + 1}"] = dict(
            w=0.1 * jax.random.normal(kw, (cout, cin, KSIZE), jnp.float32),
            b=0.1 * jax.random.normal(kb, (cout,), jnp.float32),
            gamma=1.0 + 0.1 * jax.random.normal(kg, (cout,), jnp.float32),
            beta=0.1 * jax.random.normal(kbe, (cout,), jnp.float32),
            mean=jnp.zeros((cout,), jnp.float32),   # BN running stats (PyTorch init)
            var=jnp.ones((cout,), jnp.float32),
        )
        cin = cout
    return params


def ref_forward(x, params, eps=1e-5):
    """Pure-JAX reference matching the PyTorch module in eval mode (unfused)."""
    def conv(y, w, b):
        yp = jnp.pad(y, ((0, 0), (0, 0), (PAD, PAD)), mode="edge")
        out = jax.lax.conv_general_dilated(
            yp, w, window_strides=(1,), padding="VALID",
            dimension_numbers=("NCH", "OIH", "NCH"))
        return out + b[None, :, None]

    def bn(y, p):
        return (p["gamma"][None, :, None] * (y - p["mean"][None, :, None])
                / jnp.sqrt(p["var"][None, :, None] + eps)
                + p["beta"][None, :, None])

    def pool(y, w, ceil_mode=False):
        L = y.shape[-1]
        Lout = -(-L // w) if ceil_mode else L // w
        cols = [y[:, :, j * w:min(j * w + w, L)].mean(axis=-1) for j in range(Lout)]
        return jnp.stack(cols, axis=-1)

    y = x
    for i, wdw in enumerate(WINDOWS):
        p = params[f"layer{i + 1}"]
        y = jax.nn.relu(bn(conv(y, p["w"], p["b"]), p))
        y = pool(y, wdw, ceil_mode=(i == 2))
    return y.reshape(y.shape[0], -1)


if __name__ == "__main__":
    key = jax.random.PRNGKey(0)
    k_x, k_p = jax.random.split(key)

    N, C_IN, L = 2, 4, 16
    x = jax.random.normal(k_x, (N, C_IN, L), jnp.float32)
    params = make_params(k_p, C_IN)

    out = jax.block_until_ready(conv_block_forward(x, params))
    ref = jax.block_until_ready(ref_forward(x, params))
    np.testing.assert_allclose(np.asarray(out), np.asarray(ref),
                               rtol=1e-4, atol=1e-5)

    print("KERNEL_OK")
</pallas_src>

<mosaic_0001>
module attributes {stable_mosaic.version = 11 : i64} {
  func.func @conv_block_kernel(%arg0: i32, %arg1: memref<2x64xf32, #tpu.memory_space<vmem>>, %arg2: memref<64x512xf32, #tpu.memory_space<vmem>>, %arg3: memref<1x512xf32, #tpu.memory_space<vmem>>, %arg4: memref<512x128xf32, #tpu.memory_space<vmem>>, %arg5: memref<1x128xf32, #tpu.memory_space<vmem>>, %arg6: memref<128x16xf32, #tpu.memory_space<vmem>>, %arg7: memref<1x16xf32, #tpu.memory_space<vmem>>, %arg8: memref<16x4xf32, #tpu.memory_space<vmem>>, %arg9: memref<2x4xf32, #tpu.memory_space<vmem>>) attributes {dimension_semantics = [#tpu.dimension_semantics<parallel>], iteration_bounds = array<i64: 1>, scalar_prefetch = 0 : i64, scratch_operands = 0 : i64, tpu.core_type = #tpu.core_type<tc>, window_params = [{transform_indices = @transform_0, window_bounds = array<i64: 2, 64>}, {pipeline_mode = #tpu.pipeline_mode<synchronous>, transform_indices = @transform_1, window_bounds = array<i64: 64, 512>}, {pipeline_mode = #tpu.pipeline_mode<synchronous>, transform_indices = @transform_2, window_bounds = array<i64: 1, 512>}, {pipeline_mode = #tpu.pipeline_mode<synchronous>, transform_indices = @transform_3, window_bounds = array<i64: 512, 128>}, {pipeline_mode = #tpu.pipeline_mode<synchronous>, transform_indices = @transform_4, window_bounds = array<i64: 1, 128>}, {pipeline_mode = #tpu.pipeline_mode<synchronous>, transform_indices = @transform_5, window_bounds = array<i64: 128, 16>}, {pipeline_mode = #tpu.pipeline_mode<synchronous>, transform_indices = @transform_6, window_bounds = array<i64: 1, 16>}, {pipeline_mode = #tpu.pipeline_mode<synchronous>, transform_indices = @transform_7, window_bounds = array<i64: 16, 4>}, {transform_indices = @transform_8, window_bounds = array<i64: 2, 4>}]} {
    %c0 = arith.constant 0 : index
    %c0_0 = arith.constant 0 : index
    %0 = vector.load %arg1[%c0, %c0_0] : memref<2x64xf32, #tpu.memory_space<vmem>>, vector<2x64xf32>
    %c0_1 = arith.constant 0 : index
    %c0_2 = arith.constant 0 : index
    %1 = vector.load %arg2[%c0_1, %c0_2] : memref<64x512xf32, #tpu.memory_space<vmem>>, vector<64x512xf32>
    %cst = arith.constant dense<0.000000e+00> : vector<2x512xf32>
    %2 = tpu.matmul %0, %1, %cst {dimension_numbers = #tpu.dot_dimension_numbers<[1], [0], [0], [1], [0, 0, 1, 1], [], []>} : vector<2x64xf32>, vector<64x512xf32>, vector<2x512xf32> -> vector<2x512xf32>
    %c0_3 = arith.constant 0 : index
    %c0_4 = arith.constant 0 : index
    %3 = vector.load %arg3[%c0_3, %c0_4] : memref<1x512xf32, #tpu.memory_space<vmem>>, vector<1x512xf32>
    %4 = vector.broadcast %3 : vector<1x512xf32> to vector<2x512xf32>
    %5 = arith.addf %2, %4 : vector<2x512xf32>
    %cst_5 = arith.constant 0.000000e+00 : f32
    %6 = vector.broadcast %cst_5 : f32 to vector<2x512xf32>
    %7 = arith.maximumf %5, %6 : vector<2x512xf32>
    %c0_6 = arith.constant 0 : index
    %c0_7 = arith.constant 0 : index
    %8 = vector.load %arg4[%c0_6, %c0_7] : memref<512x128xf32, #tpu.memory_space<vmem>>, vector<512x128xf32>
    %cst_8 = arith.constant dense<0.000000e+00> : vector<2x128xf32>
    %9 = tpu.matmul %7, %8, %cst_8 {dimension_numbers = #tpu.dot_dimension_numbers<[1], [0], [0], [1], [0, 0, 1, 1], [], []>} : vector<2x512xf32>, vector<512x128xf32>, vector<2x128xf32> -> vector<2x128xf32>
    %c0_9 = arith.constant 0 : index
    %c0_10 = arith.constant 0 : index
    %10 = vector.load %arg5[%c0_9, %c0_10] : memref<1x128xf32, #tpu.memory_space<vmem>>, vector<1x128xf32>
    %11 = vector.broadcast %10 : vector<1x128xf32> to vector<2x128xf32>
    %12 = arith.addf %9, %11 : vector<2x128xf32>
    %cst_11 = arith.constant 0.000000e+00 : f32
    %13 = vector.broadcast %cst_11 : f32 to vector<2x128xf32>
    %14 = arith.maximumf %12, %13 : vector<2x128xf32>
    %c0_12 = arith.constant 0 : index
    %c0_13 = arith.constant 0 : index
    %15 = vector.load %arg6[%c0_12, %c0_13] : memref<128x16xf32, #tpu.memory_space<vmem>>, vector<128x16xf32>
    %cst_14 = arith.constant dense<0.000000e+00> : vector<2x16xf32>
    %16 = tpu.matmul %14, %15, %cst_14 {dimension_numbers = #tpu.dot_dimension_numbers<[1], [0], [0], [1], [0, 0, 1, 1], [], []>} : vector<2x128xf32>, vector<128x16xf32>, vector<2x16xf32> -> vector<2x16xf32>
    %c0_15 = arith.constant 0 : index
    %c0_16 = arith.constant 0 : index
    %17 = vector.load %arg7[%c0_15, %c0_16] : memref<1x16xf32, #tpu.memory_space<vmem>>, vector<1x16xf32>
    %18 = vector.broadcast %17 : vector<1x16xf32> to vector<2x16xf32>
    %19 = arith.addf %16, %18 : vector<2x16xf32>
    %cst_17 = arith.constant 0.000000e+00 : f32
    %20 = vector.broadcast %cst_17 : f32 to vector<2x16xf32>
    %21 = arith.maximumf %19, %20 : vector<2x16xf32>
    %c0_18 = arith.constant 0 : index
    %c0_19 = arith.constant 0 : index
    %22 = vector.load %arg8[%c0_18, %c0_19] : memref<16x4xf32, #tpu.memory_space<vmem>>, vector<16x4xf32>
    %cst_20 = arith.constant dense<0.000000e+00> : vector<2x4xf32>
    %23 = tpu.matmul %21, %22, %cst_20 {dimension_numbers = #tpu.dot_dimension_numbers<[1], [0], [0], [1], [0, 0, 1, 1], [], []>} : vector<2x16xf32>, vector<16x4xf32>, vector<2x4xf32> -> vector<2x4xf32>
    %c0_21 = arith.constant 0 : index
    %c0_22 = arith.constant 0 : index
    %24 = vector.load %arg9[%c0_21, %c0_22] : memref<2x4xf32, #tpu.memory_space<vmem>>, vector<2x4xf32>
    tpu.vector_store %arg9[%c0_21, %c0_22], %23 {strides = array<i32>} : memref<2x4xf32, #tpu.memory_space<vmem>>, vector<2x4xf32>,
    return
  }
  func.func @transform_0(%arg0: i32) -> (i32, i32) {
    %c0_i32 = arith.constant 0 : i32
    %c0_i32_0 = arith.constant 0 : i32
    return %arg0, %c0_i32 : i32, i32
  }
  func.func @transform_1(%arg0: i32) -> (i32, i32) {
    %c0_i32 = arith.constant 0 : i32
    %c0_i32_0 = arith.constant 0 : i32
    %c0_i32_1 = arith.constant 0 : i32
    return %c0_i32, %c0_i32_0 : i32, i32
  }
  func.func @transform_2(%arg0: i32) -> (i32, i32) {
    %c0_i32 = arith.constant 0 : i32
    %c0_i32_0 = arith.constant 0 : i32
    %c0_i32_1 = arith.constant 0 : i32
    return %c0_i32, %c0_i32_0 : i32, i32
  }
  func.func @transform_3(%arg0: i32) -> (i32, i32) {
    %c0_i32 = arith.constant 0 : i32
    %c0_i32_0 = arith.constant 0 : i32
    %c0_i32_1 = arith.constant 0 : i32
    return %c0_i32, %c0_i32_0 : i32, i32
  }
  func.func @transform_4(%arg0: i32) -> (i32, i32) {
    %c0_i32 = arith.constant 0 : i32
    %c0_i32_0 = arith.constant 0 : i32
    %c0_i32_1 = arith.constant 0 : i32
    return %c0_i32, %c0_i32_0 : i32, i32
  }
  func.func @transform_5(%arg0: i32) -> (i32, i32) {
    %c0_i32 = arith.constant 0 : i32
    %c0_i32_0 = arith.constant 0 : i32
    %c0_i32_1 = arith.constant 0 : i32
    return %c0_i32, %c0_i32_0 : i32, i32
  }
  func.func @transform_6(%arg0: i32) -> (i32, i32) {
    %c0_i32 = arith.constant 0 : i32
    %c0_i32_0 = arith.constant 0 : i32
    %c0_i32_1 = arith.constant 0 : i32
    return %c0_i32, %c0_i32_0 : i32, i32
  }
  func.func @transform_7(%arg0: i32) -> (i32, i32) {
    %c0_i32 = arith.constant 0 : i32
    %c0_i32_0 = arith.constant 0 : i32
    %c0_i32_1 = arith.constant 0 : i32
    return %c0_i32, %c0_i32_0 : i32, i32
  }
  func.func @transform_8(%arg0: i32) -> (i32, i32) {
    %c0_i32 = arith.constant 0 : i32
    %c0_i32_0 = arith.constant 0 : i32
    return %arg0, %c0_i32 : i32, i32
  }
}

</mosaic_0001>

<bundles_post_ra>
// kernel: tpu_custom_call.1
= control target key start
LH: loop header
LB: loop body
LE: loop exit
PB: predicated region body
PF: predicated region fallthrough
CT: control target
= control target key end

     0   :  { %13 = vsyncpa [#allocation3], 0  ;;  %s658_s0 = inlined_call_operand.vmem [shape: f32[2,64], index: 0, kind: input, shape index: {}]   ;;  %s659_s1 = inlined_call_operand.hbm [shape: f32[64,512], index: 1, kind: input, shape index: {}]   ;;  %s660_s2 = inlined_call_operand.vmem [shape: f32[1,512], index: 2, kind: input, shape index: {}]   ;;  %s661_s3 = inlined_call_operand.hbm [shape: f32[512,128], index: 3, kind: input, shape index: {}]   ;;  %s662_s4 = inlined_call_operand.vmem [shape: f32[1,128], index: 4, kind: input, shape index: {}]   ;;  %s663_s5 = inlined_call_operand.vmem [shape: f32[128,16], index: 5, kind: input, shape index: {}]   ;;  %s664_s6 = inlined_call_operand.vmem [shape: f32[1,16], index: 6, kind: input, shape index: {}]   ;;  %s665_s7 = inlined_call_operand.vmem [shape: f32[16,4], index: 7, kind: input, shape index: {}]   ;;  %s666_s8 = inlined_call_operand.hbm [shape: f32[2,4], index: 8, kind: output, shape index: {}]  }
   0x1   :  { %14 = vsyncpa [#allocation6], 0 }
   0x2   :  { %15 = vsyncpa [#allocation4], 0  ;;  %s22_s29 = sshll.u32 %s659_s1, 4  ;;  %s521_s30 = smov [#allocation2]   ;;  %s23_s29 = int_to_ptr.hbm [resolvable:$true] %s22_s29 }
   0x3   :  { %s24_s9 = sshll.u32 %s521_s30, 4  ;;  %s37_s12 = sshll.u32 %s661_s3, 4  ;;  %s25_s9 = int_to_ptr.vmem [resolvable:$true] %s24_s9  ;;  %s38_s12 = int_to_ptr.hbm [resolvable:$true] %s37_s12 }
   0x4   :  { %s522_s13 = smov 512   ;;  %s523_s14 = smov 32  }
   0x5   :  { %30 = dma.hbm_to_vmem [thread:$0]  %s23_s29, 4096, %s25_s9, [#allocation3], %s522_s13, %s522_s13, %s523_s14  }
   0x6   :  { %s524_s15 = smov [#allocation5]   ;;  %s525_s17 = smov 128  }
   0x7   :  { %s39_s16 = sshll.u32 %s524_s15, 4  ;;  %s526_s18 = smov 8   ;;  %s40_s16 = int_to_ptr.vmem [resolvable:$true] %s39_s16 }
   0x8   :  { %45 = dma.hbm_to_vmem [thread:$0]  %s38_s12, 8192, %s40_s16, [#allocation6], %s525_s17, %s525_s17, %s526_s18  }
   0x9   :  { %515 = dma.done.wait [#allocation3], 4096  }
   0xa   :  { %516 = vsyncadd [#allocation3], 4294963200 }
   0xb   :  { %517 = dma.done.wait [#allocation6], 8192  }
   0xc   :  { %518 = vsyncadd [#allocation6], 4294959104  ;;  %v91_v0 = vld [vmem:[#allocation2 + $0xe0] sm:$0xff]  ;;  %v92_v3 = vld [vmem:[#allocation2 + $0xe8] sm:$0xff]  ;;  %vm105_vm0 = vcmask 523264   ;;  %vm385_vm1 = vcmask 130048  }
   0xd   :  { %v87_v1 = vld [vmem:[#allocation2 + $0xc0] sm:$0xff]  ;;  %117 = vmatpush.msra.mxu2 %v91_v0  ;;  %137 = vmatpush.msra.mxu1 %v92_v3  ;;  %v88_v4 = vld [vmem:[#allocation2 + $0xc8] sm:$0xff]  ;;  %v94_v6 = vld [vmem:[#allocation2 + $0xf8] sm:$0xff]  ;;  %s418_s13 = sshll.u32 %s666_s8, 4  ;;  %vm409_vm2 = vcmask 25600   ;;  %s419_s13 = int_to_ptr.hbm [resolvable:$true] %s418_s13 }
   0xe   :  { %v83_v2 = vld [vmem:[#allocation2 + $0xa0] sm:$0xff]  ;;  %v84_v7 = vld [vmem:[#allocation2 + $0xa8] sm:$0xff]  ;;  %v90_v8 = vld [vmem:[#allocation2 + $0xd8] sm:$0xff]  ;;  %177 = vmatpush.msra.mxu3 %v94_v6 }
   0xf   :  { %118 = vmatpush.msra.mxu2 %v87_v1  ;;  %v79_v5 = vld [vmem:[#allocation2 + $0x80] sm:$0xff]  ;;  %138 = vmatpush.msra.mxu1 %v88_v4  ;;  %v80_v10 = vld [vmem:[#allocation2 + $0x88] sm:$0xff]  ;;  %v86_v11 = vld [vmem:[#allocation2 + $0xb8] sm:$0xff] }
  0x10   :  { %v75_v9 = vld [vmem:[#allocation2 + $0x60] sm:$0xff]  ;;  %178 = vmatpush.msra.mxu3 %v90_v8  ;;  %v76_v13 = vld [vmem:[#allocation2 + $0x68] sm:$0xff]  ;;  %v82_v14 = vld [vmem:[#allocation2 + $0x98] sm:$0xff] }
  0x11   :  { %119 = vmatpush.msra.mxu2 %v83_v2  ;;  %139 = vmatpush.msra.mxu1 %v84_v7  ;;  %v71_v12 = vld [vmem:[#allocation2 + $0x40] sm:$0xff]  ;;  %v72_v16 = vld [vmem:[#allocation2 + $0x48] sm:$0xff]  ;;  %v78_v17 = vld [vmem:[#allocation2 + $0x78] sm:$0xff] }
  0x12   :  { %v67_v15 = vld [vmem:[#allocation2 + $0x20] sm:$0xff]  ;;  %179 = vmatpush.msra.mxu3 %v86_v11  ;;  %v208_v18 = vld [vmem:[#allocation5 + $0x78] sm:$0xff]  ;;  %v207_v19 = vld [vmem:[#allocation5 + $0x70] sm:$0xff] }
  0x13   :  { %120 = vmatpush.msra.mxu2 %v79_v5  ;;  %140 = vmatpush.msra.mxu1 %v80_v10  ;;  %v63_v20 = vld [vmem:[#allocation2] sm:$0xff]  ;;  %v68_v21 = vld [vmem:[#allocation2 + $0x28] sm:$0xff]  ;;  %v93_v22 = vld [vmem:[#allocation2 + $0xf0] sm:$0xff] }
  0x14   :  { %180 = vmatpush.msra.mxu3 %v82_v14  ;;  %261 = vmatpush.msra.mxu0 %v208_v18  ;;  %v74_v23 = vld [vmem:[#allocation2 + $0x58] sm:$0xff]  ;;  %v582_v24 = vld [vmem:[%s658_s0] sm:$0x3]  ;;  %v64_v25 = vld [vmem:[#allocation2 + $0x8] sm:$0xff] }
  0x15   :  { %121 = vmatpush.msra.mxu2 %v75_v9  ;;  %141 = vmatpush.msra.mxu1 %v76_v13  ;;  %v89_v26 = vld [vmem:[#allocation2 + $0xd0] sm:$0xff]  ;;  %v70_v27 = vld [vmem:[#allocation2 + $0x38] sm:$0xff]  ;;  %v206_v28 = vld [vmem:[#allocation5 + $0x68] sm:$0xff] }
  0x16   :  { %181 = vmatpush.msra.mxu3 %v78_v17  ;;  %262 = vmatpush.msra.mxu0 %v207_v19  ;;  %v85_v29 = vld [vmem:[#allocation2 + $0xb0] sm:$0xff]  ;;  %v66_v30 = vld [vmem:[#allocation2 + $0x18] sm:$0xff]  ;;  %v205_v33 = vld [vmem:[#allocation5 + $0x60] sm:$0xff] }
  0x17   :  { %122 = vmatpush.msra.mxu2 %v71_v12  ;;  %142 = vmatpush.msra.mxu1 %v72_v16  ;;  %v224_v31 = vld [vmem:[#allocation5 + $0xf8] sm:$0xff]  ;;  %v81_v32 = vld [vmem:[#allocation2 + $0x90] sm:$0xff]  ;;  %v222_v38 = vld [vmem:[#allocation5 + $0xe8] sm:$0xff] }
  0x18   :  { %182 = vmatpush.msra.mxu3 %v74_v23  ;;  %263 = vmatpush.msra.mxu0 %v206_v28  ;;  %v223_v34 = vld [vmem:[#allocation5 + $0xf0] sm:$0xff]  ;;  %v256_v35 = vld [vmem:[#allocation5 + $0x1f8] sm:$0xff]  ;;  %v221_v43 = vld [vmem:[#allocation5 + $0xe0] sm:$0xff] }
  0x19   :  { %123 = vmatpush.msra.mxu2 %v67_v15  ;;  %143 = vmatpush.msra.mxu1 %v68_v21  ;;  %v77_v36 = vld [vmem:[#allocation2 + $0x70] sm:$0xff]  ;;  %v204_v37 = vld [vmem:[#allocation5 + $0x58] sm:$0xff]  ;;  %v254_v44 = vld [vmem:[#allocation5 + $0x1e8] sm:$0xff] }
  0x1a   :  { %183 = vmatpush.msra.mxu3 %v70_v27  ;;  %264 = vmatpush.msra.mxu0 %v205_v33  ;;  %v255_v39 = vld [vmem:[#allocation5 + $0x1f0] sm:$0xff]  ;;  %v202_v45 = vld [vmem:[#allocation5 + $0x48] sm:$0xff]  ;;  %v220_v46 = vld [vmem:[#allocation5 + $0xd8] sm:$0xff] }
  0x1b   :  { %124 = vmatpush.msra.mxu2 %v63_v20  ;;  %144 = vmatpush.msra.mxu1 %v64_v25  ;;  %v73_v40 = vld [vmem:[#allocation2 + $0x50] sm:$0xff]  ;;  %v253_v47 = vld [vmem:[#allocation5 + $0x1e0] sm:$0xff]  ;;  %v240_v51 = vld [vmem:[#allocation5 + $0x178] sm:$0xff] }
  0x1c   :  { %429 = vmatmul.msk.f32.vlgmr.msra.gmra.mxu2 %vm105_vm0, %v582_v24  ;;  %430 = vmatmul.msk.f32.vlgmr.msra.gmra.mxu1 %vm105_vm0, %v582_v24  ;;  %v203_v41 = vld [vmem:[#allocation5 + $0x50] sm:$0xff]  ;;  %v201_v49 = vld [vmem:[#allocation5 + $0x40] sm:$0xff]  ;;  %v200_v52 = vld [vmem:[#allocation5 + $0x38] sm:$0xff] }
  0x1d   :  { %157 = vmatpush.msrb.mxu2 %v93_v22  ;;  %184 = vmatpush.msra.mxu3 %v66_v30  ;;  %v69_v42 = vld [vmem:[#allocation2 + $0x30] sm:$0xff]  ;;  %v218_v53 = vld [vmem:[#allocation5 + $0xc8] sm:$0xff]  ;;  %v252_v54 = vld [vmem:[#allocation5 + $0x1d8] sm:$0xff] }
  0x1e   :  { %432 = vmatmul.msk.f32.vlgmr.msra.gmra.mxu3 %vm105_vm0, %v582_v24  ;;  %281 = vmatpush.msrb.mxu1 %v224_v31  ;;  %v65_v48 = vld [vmem:[#allocation2 + $0x10] sm:$0xff]  ;;  %v217_v57 = vld [vmem:[#allocation5 + $0xc0] sm:$0xff]  ;;  %v238_v59 = vld [vmem:[#allocation5 + $0x168] sm:$0xff] }
  0x1f   :  { %158 = vmatpush.msrb.mxu2 %v89_v26  ;;  %321 = vmatpush.msrb.mxu3 %v256_v35  ;;  %v219_v50 = vld [vmem:[#allocation5 + $0xd0] sm:$0xff]  ;;  %v198_v60 = vld [vmem:[#allocation5 + $0x28] sm:$0xff]  ;;  %v216_v61 = vld [vmem:[#allocation5 + $0xb8] sm:$0xff] }
  0x20   :  { %282 = vmatpush.msrb.mxu1 %v223_v34  ;;  %265 = vmatpush.msra.mxu0 %v204_v37  ;;  %v239_v55 = vld [vmem:[#allocation5 + $0x170] sm:$0xff]  ;;  %v250_v62 = vld [vmem:[#allocation5 + $0x1c8] sm:$0xff]  ;;  %v237_v63 = vld [vmem:[#allocation5 + $0x160] sm:$0xff] }
  0x21   :  { %159 = vmatpush.msrb.mxu2 %v85_v29  ;;  %322 = vmatpush.msrb.mxu3 %v255_v39  ;;  %v199_v56 = vld [vmem:[#allocation5 + $0x30] sm:$0xff]  ;;  %v197_v0 = vld [vmem:[#allocation5 + $0x20] sm:$0xff]  ;;  %v236_v3 = vld [vmem:[#allocation5 + $0x158] sm:$0xff] }
  0x22   :  { %283 = vmatpush.msrb.mxu1 %v222_v38  ;;  %266 = vmatpush.msra.mxu0 %v203_v41  ;;  %v251_v58 = vld [vmem:[#allocation5 + $0x1d0] sm:$0xff]  ;;  %v249_v2 = vld [vmem:[#allocation5 + $0x1c0] sm:$0xff]  ;;  %v196_v4 = vld [vmem:[#allocation5 + $0x18] sm:$0xff] }
  0x23   :  { %160 = vmatpush.msrb.mxu2 %v81_v32  ;;  %323 = vmatpush.msrb.mxu3 %v254_v44  ;;  %v215_v1 = vld [vmem:[#allocation5 + $0xb0] sm:$0xff]  ;;  %v214_v5 = vld [vmem:[#allocation5 + $0xa8] sm:$0xff]  ;;  %v213_v7 = vld [vmem:[#allocation5 + $0xa0] sm:$0xff] }
  0x24   :  { %284 = vmatpush.msrb.mxu1 %v221_v43  ;;  %267 = vmatpush.msra.mxu0 %v202_v45  ;;  %v235_v6 = vld [vmem:[#allocation5 + $0x150] sm:$0xff]  ;;  %v234_v8 = vld [vmem:[#allocation5 + $0x148] sm:$0xff]  ;;  %v233_v9 = vld [vmem:[#allocation5 + $0x140] sm:$0xff] }
  0x25   :  { %161 = vmatpush.msrb.mxu2 %v77_v36  ;;  %324 = vmatpush.msrb.mxu3 %v253_v47  ;;  %v232_v10 = vld [vmem:[#allocation5 + $0x138] sm:$0xff]  ;;  %v195_v11 = vld [vmem:[#allocation5 + $0x10] sm:$0xff]  ;;  %v194_v15 = vld [vmem:[#allocation5 + $0x8] sm:$0xff] }
  0x26   :  { %285 = vmatpush.msrb.mxu1 %v220_v46  ;;  %268 = vmatpush.msra.mxu0 %v201_v49  ;;  %v212_v12 = vld [vmem:[#allocation5 + $0x98] sm:$0xff]  ;;  %v231_v13 = vld [vmem:[#allocation5 + $0x130] sm:$0xff]  ;;  %v230_v17 = vld [vmem:[#allocation5 + $0x128] sm:$0xff] }
  0x27   :  { %162 = vmatpush.msrb.mxu2 %v73_v40  ;;  %325 = vmatpush.msrb.mxu3 %v252_v54  ;;  %v248_v14 = vld [vmem:[#allocation5 + $0x1b8] sm:$0xff]  ;;  %v211_v16 = vld [vmem:[#allocation5 + $0x90] sm:$0xff]  ;;  %v193_v19 = vld [vmem:[#allocation5] sm:$0xff] }
  0x28   :  { %286 = vmatpush.msrb.mxu1 %v219_v50  ;;  %269 = vmatpush.msra.mxu0 %v200_v52  ;;  %v247_v18 = vld [vmem:[#allocation5 + $0x1b0] sm:$0xff]  ;;  %v210_v20 = vld [vmem:[#allocation5 + $0x88] sm:$0xff]  ;;  %v229_v21 = vld [vmem:[#allocation5 + $0x120] sm:$0xff] }
  0x29   :  { %163 = vmatpush.msrb.mxu2 %v69_v42  ;;  %326 = vmatpush.msrb.mxu3 %v251_v58  ;;  %v246_v22 = vld [vmem:[#allocation5 + $0x1a8] sm:$0xff]  ;;  %v209_v23 = vld [vmem:[#allocation5 + $0x80] sm:$0xff]  ;;  %v227_v26 = vld [vmem:[#allocation5 + $0x110] sm:$0xff] }
  0x2a   :  { %287 = vmatpush.msrb.mxu1 %v218_v53  ;;  %270 = vmatpush.msra.mxu0 %v199_v56  ;;  %v245_v25 = vld [vmem:[#allocation5 + $0x1a0] sm:$0xff]  ;;  %v244_v27 = vld [vmem:[#allocation5 + $0x198] sm:$0xff]  ;;  %v226_v28 = vld [vmem:[#allocation5 + $0x108] sm:$0xff] }
  0x2b   :  { %164 = vmatpush.msrb.mxu2 %v65_v48  ;;  %327 = vmatpush.msrb.mxu3 %v250_v62  ;;  %v243_v29 = vld [vmem:[#allocation5 + $0x190] sm:$0xff]  ;;  %v225_v30 = vld [vmem:[#allocation5 + $0x100] sm:$0xff]  ;;  %v242_v31 = vld [vmem:[#allocation5 + $0x188] sm:$0xff] }
  0x2c   :  { %431 = vmatmul.msk.f32.vlgmr.msrb.gmra.mxu2 %vm105_vm0, %v582_v24  ;;  %288 = vmatpush.msrb.mxu1 %v217_v57  ;;  %v228_v24 = vld [vmem:[#allocation5 + $0x118] sm:$0xff]  ;;  %v241_v32 = vld [vmem:[#allocation5 + $0x180] sm:$0xff]  ;;  %v356_v34 = vld [vmem:[%s663_s5 + $0x70] sm:$0xff] }
  0x2d   :  { %301 = vmatpush.msra.mxu2 %v240_v51  ;;  %271 = vmatpush.msra.mxu0 %v198_v60  ;;  %v357_v33 = vld [vmem:[%s663_s5 + $0x78] sm:$0xff]  ;;  %v355_v35 = vld [vmem:[%s663_s5 + $0x68] sm:$0xff]  ;;  %v354_v36 = vld [vmem:[%s663_s5 + $0x60] sm:$0xff] }
  0x2e   :  { %289 = vmatpush.msrb.mxu1 %v216_v61  ;;  %328 = vmatpush.msrb.mxu3 %v249_v2  ;;  %v95_v37 = vld [vmem:[%s660_s2] sm:$0xf]  ;;  %v353_v39 = vld [vmem:[%s663_s5 + $0x58] sm:$0xff]  ;;  %v351_v56 = vld [vmem:[%s663_s5 + $0x48] sm:$0xff] }
  0x2f   :  { %302 = vmatpush.msra.mxu2 %v239_v55  ;;  %272 = vmatpush.msra.mxu0 %v197_v0  ;;  %v98_v38 = vperm.slane %v95_v37, 1  ;;  %v97_v41 = vperm.slane %v95_v37, 0  ;;  %v100_v46 = vperm.slane %v95_v37, 3  ;;  %v99_v51 = vperm.slane %v95_v37, 2  ;;  %v352_v55 = vld [vmem:[%s663_s5 + $0x50] sm:$0xff]  ;;  %v350_v57 = vld [vmem:[%s663_s5 + $0x40] sm:$0xff] }
  0x30   :  { %290 = vmatpush.msrb.mxu1 %v215_v1  ;;  %329 = vmatpush.msrb.mxu3 %v248_v14  ;;  %v349_v58 = vld [vmem:[%s663_s5 + $0x38] sm:$0xff]  ;;  %v347_v60 = vld [vmem:[%s663_s5 + $0x28] sm:$0xff]  ;;  %v346_v61 = vld [vmem:[%s663_s5 + $0x20] sm:$0xff] }
  0x31   :  { %303 = vmatpush.msra.mxu2 %v238_v59  ;;  %273 = vmatpush.msra.mxu0 %v196_v4  ;;  %v348_v59 = vld [vmem:[%s663_s5 + $0x30] sm:$0xff]  ;;  %v345_v62 = vld [vmem:[%s663_s5 + $0x18] sm:$0xff]  ;;  %v343_v0 = vld [vmem:[%s663_s5 + $0x8] sm:$0xff] }
  0x32   :  { %291 = vmatpush.msrb.mxu1 %v214_v5  ;;  %330 = vmatpush.msrb.mxu3 %v247_v18  ;;  %v342_v1 = vld [vmem:[%s663_s5] sm:$0xff]  ;;  %v384_v2 = vld [vmem:[%s665_s7 + $0x8] sm:$0xff] }
  0x33   :  { %304 = vmatpush.msra.mxu2 %v237_v63  ;;  %274 = vmatpush.msra.mxu0 %v195_v11  ;;  %v344_v63 = vld [vmem:[%s663_s5 + $0x10] sm:$0xff]  ;;  %v442_v14 = vld [vmem:[%s664_s6] ss:$0 sm:$0xff] }
  0x34   :  { %292 = vmatpush.msrb.mxu1 %v213_v7  ;;  %331 = vmatpush.msrb.mxu3 %v246_v22 }
  0x35   :  { %305 = vmatpush.msra.mxu2 %v236_v3  ;;  %275 = vmatpush.msra.mxu0 %v194_v15  ;;  %v441_v3 = vld [vmem:[%s662_s4] ss:$0 sm:$0xff]  ;;  %s527_s4 = smov [#allocation7]  }
  0x36   :  { %293 = vmatpush.msrb.mxu1 %v212_v12  ;;  %332 = vmatpush.msrb.mxu3 %v245_v25  ;;  %s416_s10 = sshll.u32 %s527_s4, 4  ;;  %s417_s10 = int_to_ptr.vmem [resolvable:$true] %s416_s10 }
  0x37   :  { %306 = vmatpush.msra.mxu2 %v235_v6  ;;  %276 = vmatpush.msra.mxu0 %v193_v19 }
  0x38   :  { %294 = vmatpush.msrb.mxu1 %v211_v16  ;;  %333 = vmatpush.msrb.mxu3 %v244_v27 }
  0x39   :  { %307 = vmatpush.msra.mxu2 %v234_v8  ;;  %362 = vmatpush.msrb.mxu0 %v357_v33 }
  0x3a   :  { %295 = vmatpush.msrb.mxu1 %v210_v20  ;;  %334 = vmatpush.msrb.mxu3 %v243_v29 }
  0x3b   :  { %308 = vmatpush.msra.mxu2 %v233_v9  ;;  %363 = vmatpush.msrb.mxu0 %v356_v34 }
  0x3c   :  { %296 = vmatpush.msrb.mxu1 %v209_v23  ;;  %335 = vmatpush.msrb.mxu3 %v242_v31 }
  0x3d   :  { %309 = vmatpush.msra.mxu2 %v232_v10  ;;  %364 = vmatpush.msrb.mxu0 %v355_v35 }
  0x3e   :  { %336 = vmatpush.msrb.mxu3 %v241_v32  ;;  %403 = vmatpush.msra.mxu1 %v384_v2 }
  0x3f   :  { %310 = vmatpush.msra.mxu2 %v231_v13  ;;  %365 = vmatpush.msrb.mxu0 %v354_v36  ;;  %v383_v13 = vld [vmem:[%s665_s7] sm:$0xff] }
  0x40   :  { %404 = vmatpush.msra.mxu1 %v383_v13 }
  0x41   :  { %311 = vmatpush.msra.mxu2 %v230_v17  ;;  %366 = vmatpush.msrb.mxu0 %v353_v39 }
  0x43   :  { %312 = vmatpush.msra.mxu2 %v229_v21  ;;  %367 = vmatpush.msrb.mxu0 %v352_v55 }
  0x45   :  { %313 = vmatpush.msra.mxu2 %v228_v24  ;;  %368 = vmatpush.msrb.mxu0 %v351_v56 }
  0x47   :  { %314 = vmatpush.msra.mxu2 %v227_v26  ;;  %369 = vmatpush.msrb.mxu0 %v350_v57 }
  0x49   :  { %315 = vmatpush.msra.mxu2 %v226_v28  ;;  %370 = vmatpush.msrb.mxu0 %v349_v58 }
  0x4b   :  { %316 = vmatpush.msra.mxu2 %v225_v30  ;;  %371 = vmatpush.msrb.mxu0 %v348_v59 }
  0x4d   :  { %372 = vmatpush.msrb.mxu0 %v347_v60 }
  0x4f   :  { %373 = vmatpush.msrb.mxu0 %v346_v61 }
  0x51   :  { %374 = vmatpush.msrb.mxu0 %v345_v62 }
  0x53   :  { %375 = vmatpush.msrb.mxu0 %v344_v63 }
  0x55   :  { %376 = vmatpush.msrb.mxu0 %v343_v0 }
  0x57   :  { %377 = vmatpush.msrb.mxu0 %v342_v1 }
  0x99   :  { %v146_v40 = vpop.f32.mrf.mxu1 }
  0x9a   :  { %v147_v42 = vadd.f32 %v146_v40, %v98_v38 }
  0x9c   :  { %v190_v43 = vmax.f32 %v147_v42, 0.0 }
  0x9e   :  { %297 = vmatmul.f32.vlgmr.msrb.gmra.mxu1 %v190_v43 }
  0x9f   :  { %v126_v44 = vpop.f32.mrf.mxu2 }
  0xa0   :  { %v127_v45 = vadd.f32 %v126_v44, %v97_v41 }
  0xa1   :  { %v186_v48 = vpop.f32.mrf.mxu3 }
  0xa2   :  { %v189_v47 = vmax.f32 %v127_v45, 0.0  ;;  %v187_v49 = vadd.f32 %v186_v48, %v100_v46 }
  0xa4   :  { %277 = vmatmul.f32.vlgmr.msra.gmra.mxu0 %v189_v47  ;;  %v192_v50 = vmax.f32 %v187_v49, 0.0 }
  0xa6   :  { %337 = vmatmul.f32.vlgmr.msrb.gmra.mxu3 %v192_v50 }
  0xaf   :  { %v166_v52 = vpop.f32.mrf.mxu2 }
  0xb0   :  { %v167_v53 = vadd.f32 %v166_v52, %v99_v51 }
  0xb2   :  { %v191_v54 = vmax.f32 %v167_v53, 0.0 }
  0xb4   :  { %317 = vmatmul.f32.vlgmr.msra.gmra.mxu2 %v191_v54 }
 0x11b   :  { %v298_v6 = vpop.f32.mrf.mxu1 }
 0x121   :  { %v278_v4 = vpop.f32.mrf.mxu0 }
 0x122   :  { %v279_v5 = vadd.f32 %v441_v3, %v278_v4 }
 0x124   :  { %v299_v7 = vadd.f32 %v298_v6, %v279_v5 }
 0x129   :  { %v338_v9 = vpop.f32.mrf.mxu3 }
 0x137   :  { %v318_v8 = vpop.f32.mrf.mxu2 }
 0x138   :  { %v319_v10 = vadd.f32 %v318_v8, %v299_v7 }
 0x13a   :  { %v339_v11 = vadd.f32 %v338_v9, %v319_v10 }
 0x13c   :  { %v341_v12 = vmax.f32 %v339_v11, 0.0 }
 0x13e   :  { %378 = vmatmul.f32.vlgmr.msrb.gmra.mxu0 %v341_v12 }
 0x1bb   :  { %v379_v15 = vpop.f32.mrf.mxu0 }
 0x1bc   :  { %v380_v16 = vadd.f32 %v442_v14, %v379_v15 }
 0x1be   :  { %v382_v17 = vmax.f32 %v380_v16, 0.0 }
 0x1c0   :  { %433 = vmatmul.msk.f32.vlgmr.msra.gmra.mxu1 %vm385_vm1, %v382_v17 }
 0x23d   :  { %v406_v18 = vpop.f32.mrf.mxu1 }
 0x23e   :  { %410 = vst.msk [vmem:[#allocation7] sm:$0x3] %vm409_vm2, %v406_v18 }
 0x23f   :  { %421 = dma.vmem_to_hbm [thread:$0]  %s417_s10, 32, %s419_s13, [#allocation4]  }
 0x240   :  { %519 = dma.done.wait [#allocation4], 32  }
 0x241   :  { %520 = vsyncadd [#allocation4], 4294967264 }
 0x242   :  { %426 = vsyncpa [#allocation3], 1 }
 0x243   :  { %427 = vsyncpa [#allocation6], 1 }
 0x244   :  { %428 = vsyncpa [#allocation4], 1 }

</bundles_post_ra>
